<compile_context>
chip_gen: v5e
topology: v5e:2x2
jax: 0.10.0
libtpu: 0.0.40
codegen_flags: <defaults>
</compile_context>

<pallas_src>
import functools
import math

import jax
import jax.numpy as jnp
import numpy as np
from jax.experimental import pallas as pl
from jax.experimental.pallas import tpu as pltpu

HEAD_DIM = 64
NUM_GROUPS = 32
EPS = 1e-6
# Scoped-VMEM budget: sized so realistic configs (C=512, S=4096, block_q=256,
# full-sequence K/V resident) stay under v7x's 64 MiB physical VMEM; v5e/v6e
# (128 MiB physical) have ample headroom.
_VMEM_LIMIT = 48 * 1024 * 1024


# ----------------------------------------------------------------------------
# Kernel 1: GroupNorm statistics.
# grid = (B, S // block_s); sequence axis is the reduction ("arbitrary").
# ----------------------------------------------------------------------------
def _gn_stats_kernel(x_ref, p_ref, stats_ref, s1_sc, s2_sc, *, inv_count):
    si = pl.program_id(1)

    @pl.when(si == 0)
    def _():
        s1_sc[...] = jnp.zeros_like(s1_sc)
        s2_sc[...] = jnp.zeros_like(s2_sc)

    x = x_ref[0]                                        # (ts, C) f32
    ts, c = x.shape
    xr = x.reshape(ts // 8, 8, c)                       # sublane-aligned groups
    s1_sc[...] += jnp.sum(xr, axis=0)                   # VPU-only vreg adds
    s2_sc[...] += jnp.sum(xr * xr, axis=0)

    @pl.when(si == pl.num_programs(1) - 1)
    def _():
        # Single cross-sublane reduce + one (2, C) @ (C, C) group-averaging dot
        # (P[i,j] = 1/Cg if channels i, j share a group).
        s1 = jnp.sum(s1_sc[...], axis=0, keepdims=True)            # (1, C)
        s2 = jnp.sum(s2_sc[...], axis=0, keepdims=True)            # (1, C)
        s12 = jnp.concatenate([s1, s2], axis=0)                    # (2, C)
        g = jnp.dot(s12, p_ref[...], preferred_element_type=jnp.float32) * inv_count
        mean = g[0:1, :]
        # NOTE: E[x^2] - E[x]^2 form; fine for ~zero-mean activations.
        var = g[1:2, :] - mean * mean
        inv = jax.lax.rsqrt(var + EPS)
        stats_ref[0] = jnp.concatenate([mean, inv], axis=0)        # (2, C)


# ----------------------------------------------------------------------------
# Kernel 2: GroupNorm apply + qkv 1x1 conv (one wide dot, lane-dense stores).
# grid = (B, S // block_s); fully parallel.
# ----------------------------------------------------------------------------
def _norm_qkv_kernel(x_ref, stats_ref, gamma_ref, beta_ref, w_ref, b_ref,
                     q_ref, k_ref, v_ref, *, channels):
    x = x_ref[0]                                        # (ts, C) f32
    mean = stats_ref[0, 0:1, :]                         # (1, C)
    inv = stats_ref[0, 1:2, :]                          # (1, C)
    xn = ((x - mean) * inv * gamma_ref[...] + beta_ref[...]).astype(jnp.bfloat16)

    qkv = jnp.dot(xn, w_ref[...], preferred_element_type=jnp.float32)
    qkv = (qkv + b_ref[...]).astype(jnp.bfloat16)       # (ts, 3C)

    c = channels
    q_ref[0] = qkv[:, 0:c]
    k_ref[0] = qkv[:, c:2 * c]
    v_ref[0] = qkv[:, 2 * c:3 * c]


# ----------------------------------------------------------------------------
# Kernel 3: attention + output projection + residual.
# grid = (B, S // block_q); K/V for the full sequence are resident per batch
# (their block index depends only on b, so they are DMA'd once per batch).
# ----------------------------------------------------------------------------
def _attn_proj_kernel(x_ref, q_ref, k_ref, v_ref, wp_ref, bp_ref, out_ref,
                      *, num_heads, head_dim):
    # Accumulate directly into a (bq, C) value initialized with residual + bias;
    # single lane-dense store at the end, no scratch accumulators.
    acc = x_ref[0] + bp_ref[...]                        # (bq, C) f32

    for h in range(num_heads):                          # static unroll (<= 8 heads)
        lo = h * head_dim
        hi = lo + head_dim
        q_h = q_ref[0, :, lo:hi]                        # (bq, D) bf16, scale folded
        k_h = k_ref[0, :, lo:hi]                        # (S,  D) bf16
        v_h = v_ref[0, :, lo:hi]                        # (S,  D) bf16

        # scores (bq, S): NT matmul via dot_general (no materialized transpose).
        s = jax.lax.dot_general(q_h, k_h, (((1,), (1,)), ((), ())),
                                preferred_element_type=jnp.float32)
        m = jnp.max(s, axis=-1, keepdims=True)
        p = jnp.exp(s - m)                              # (bq, S) f32
        l = jnp.sum(p, axis=-1, keepdims=True)          # (bq, 1) f32

        o_h = jnp.dot(p.astype(jnp.bfloat16), v_h,
                      preferred_element_type=jnp.float32)           # (bq, D)
        o_h = o_h * (1.0 / l)                           # exact softmax normalization

        # Fold this head straight into the output projection (rows lo:hi of wproj).
        acc = acc + jnp.dot(o_h.astype(jnp.bfloat16), wp_ref[lo:hi, :],
                            preferred_element_type=jnp.float32)

    out_ref[0] = acc.astype(out_ref.dtype)


# ----------------------------------------------------------------------------
# Wrapper
# ----------------------------------------------------------------------------
def attn_block(x_nchw, params, *, block_s=256, block_q=256):
    """x_nchw: (B, C, H, W) float32.  Returns (B, C, H, W) float32."""
    B, C, H, W = x_nchw.shape
    assert C % HEAD_DIM == 0 and C % NUM_GROUPS == 0
    num_heads = C // HEAD_DIM
    D = HEAD_DIM
    S = H * W

    block_s = min(block_s, S)
    block_q = min(block_q, S)
    assert S % block_s == 0 and S % block_q == 0, \
        "sequence length (H*W) must be divisible by the tile sizes"
    assert block_s % 8 == 0 and block_q % 8 == 0

    gamma, beta, wqkv, bqkv, wproj, bproj = params

    # NCHW -> (B, S, C) tokens (see TODO at top of file).
    x = jnp.transpose(x_nchw, (0, 2, 3, 1)).reshape(B, S, C)

    # Group-averaging matrix for the GroupNorm statistics.
    cg = C // NUM_GROUPS
    gid = np.arange(C) // cg
    P = jnp.asarray((gid[:, None] == gid[None, :]).astype(np.float32) / cg)

    gamma2 = gamma.reshape(1, C).astype(jnp.float32)
    beta2 = beta.reshape(1, C).astype(jnp.float32)

    # Fold 1/sqrt(head_dim) = 0.125 (exact) into the q projection; bf16 weights.
    scale = 1.0 / math.sqrt(D)
    wqkv_s = jnp.concatenate([wqkv[:, :C] * scale, wqkv[:, C:]], axis=1)
    bqkv_s = jnp.concatenate([bqkv[:C] * scale, bqkv[C:]], axis=0)
    wqkv_bf = wqkv_s.astype(jnp.bfloat16)                       # (C, 3C)
    bqkv2 = bqkv_s.reshape(1, 3 * C).astype(jnp.float32)
    wproj_bf = wproj.astype(jnp.bfloat16)                       # (C, C)
    bproj2 = bproj.reshape(1, C).astype(jnp.float32)

    n_s = S // block_s
    n_q = S // block_q

    # ---- pass 1: GroupNorm statistics -> (B, 2, C) [mean; inv_std] ----
    stats = pl.pallas_call(
        functools.partial(_gn_stats_kernel, inv_count=1.0 / float(S)),
        out_shape=jax.ShapeDtypeStruct((B, 2, C), jnp.float32),
        grid_spec=pltpu.PrefetchScalarGridSpec(
            num_scalar_prefetch=0,
            grid=(B, n_s),
            in_specs=[
                pl.BlockSpec((1, block_s, C), lambda b, si: (b, si, 0)),
                pl.BlockSpec((C, C), lambda b, si: (0, 0)),
            ],
            out_specs=pl.BlockSpec((1, 2, C), lambda b, si: (b, 0, 0)),
            scratch_shapes=[pltpu.VMEM((8, C), jnp.float32),
                            pltpu.VMEM((8, C), jnp.float32)],
        ),
        compiler_params=pltpu.CompilerParams(
            dimension_semantics=("parallel", "arbitrary"),
            vmem_limit_bytes=_VMEM_LIMIT),
    )(x, P)

    # ---- pass 2: normalize + qkv projection (wide dot, lane-dense outputs) ----
    qkv_shape = jax.ShapeDtypeStruct((B, S, C), jnp.bfloat16)
    q_all, k_all, v_all = pl.pallas_call(
        functools.partial(_norm_qkv_kernel, channels=C),
        out_shape=(qkv_shape, qkv_shape, qkv_shape),
        grid_spec=pltpu.PrefetchScalarGridSpec(
            num_scalar_prefetch=0,
            grid=(B, n_s),
            in_specs=[
                pl.BlockSpec((1, block_s, C), lambda b, si: (b, si, 0)),  # x
                pl.BlockSpec((1, 2, C), lambda b, si: (b, 0, 0)),         # stats
                pl.BlockSpec((1, C), lambda b, si: (0, 0)),               # gamma
                pl.BlockSpec((1, C), lambda b, si: (0, 0)),               # beta
                pl.BlockSpec((C, 3 * C), lambda b, si: (0, 0)),           # wqkv
                pl.BlockSpec((1, 3 * C), lambda b, si: (0, 0)),           # bqkv
            ],
            out_specs=[
                pl.BlockSpec((1, block_s, C), lambda b, si: (b, si, 0)),  # q
                pl.BlockSpec((1, block_s, C), lambda b, si: (b, si, 0)),  # k
                pl.BlockSpec((1, block_s, C), lambda b, si: (b, si, 0)),  # v
            ],
        ),
        compiler_params=pltpu.CompilerParams(
            dimension_semantics=("parallel", "parallel"),
            vmem_limit_bytes=_VMEM_LIMIT),
    )(x, stats, gamma2, beta2, wqkv_bf, bqkv2)

    # ---- pass 3: attention + output projection + residual ----
    out_tokens = pl.pallas_call(
        functools.partial(_attn_proj_kernel, num_heads=num_heads, head_dim=D),
        out_shape=jax.ShapeDtypeStruct((B, S, C), jnp.float32),
        grid_spec=pltpu.PrefetchScalarGridSpec(
            num_scalar_prefetch=0,
            grid=(B, n_q),
            in_specs=[
                pl.BlockSpec((1, block_q, C), lambda b, qi: (b, qi, 0)),  # x residual
                pl.BlockSpec((1, block_q, C), lambda b, qi: (b, qi, 0)),  # q tile
                pl.BlockSpec((1, S, C), lambda b, qi: (b, 0, 0)),         # K (resident per b)
                pl.BlockSpec((1, S, C), lambda b, qi: (b, 0, 0)),         # V (resident per b)
                pl.BlockSpec((C, C), lambda b, qi: (0, 0)),               # wproj
                pl.BlockSpec((1, C), lambda b, qi: (0, 0)),               # bproj
            ],
            out_specs=pl.BlockSpec((1, block_q, C), lambda b, qi: (b, qi, 0)),
        ),
        compiler_params=pltpu.CompilerParams(
            dimension_semantics=("parallel", "parallel"),
            vmem_limit_bytes=_VMEM_LIMIT),
    )(x, q_all, k_all, v_all, wproj_bf, bproj2)

    # (B, S, C) -> NCHW
    return jnp.transpose(out_tokens.reshape(B, H, W, C), (0, 3, 1, 2))


# ----------------------------------------------------------------------------
# Pure-JAX reference (f32, HIGHEST matmul precision) matching PyTorch semantics.
# ----------------------------------------------------------------------------
def attn_block_reference(x_nchw, params):
    gamma, beta, wqkv, bqkv, wproj, bproj = params
    B, C, H, W = x_nchw.shape
    num_heads = C // HEAD_DIM
    S = H * W
    cg = C // NUM_GROUPS
    hp = jax.lax.Precision.HIGHEST

    xg = x_nchw.reshape(B, NUM_GROUPS, cg * H * W)
    mean = jnp.mean(xg, axis=-1, keepdims=True)
    var = jnp.mean((xg - mean) ** 2, axis=-1, keepdims=True)
    xn = ((xg - mean) / jnp.sqrt(var + EPS)).reshape(B, C, H, W)
    xn = xn * gamma[None, :, None, None] + beta[None, :, None, None]

    xn_t = jnp.transpose(xn, (0, 2, 3, 1)).reshape(B, S, C)
    qkv = jnp.matmul(xn_t, wqkv, precision=hp) + bqkv[None, None, :]
    q, k, v = jnp.split(qkv, 3, axis=-1)

    def heads(t):
        return jnp.transpose(t.reshape(B, S, num_heads, HEAD_DIM), (0, 2, 1, 3))

    qh, kh, vh = heads(q), heads(k), heads(v)
    logits = jnp.einsum("bhsd,bhtd->bhst", qh, kh, precision=hp) / math.sqrt(HEAD_DIM)
    p = jax.nn.softmax(logits, axis=-1)
    oh = jnp.einsum("bhst,bhtd->bhsd", p, vh, precision=hp)
    o = jnp.transpose(oh, (0, 2, 1, 3)).reshape(B, S, C)

    out = jnp.matmul(o, wproj, precision=hp) + bproj[None, None, :]
    out = jnp.transpose(out.reshape(B, H, W, C), (0, 3, 1, 2))
    return x_nchw + out


def make_params(key, C):
    k0, k1, k2, k3, k4, k5 = jax.random.split(key, 6)
    gamma = 1.0 + 0.1 * jax.random.normal(k0, (C,), jnp.float32)
    beta = 0.1 * jax.random.normal(k1, (C,), jnp.float32)
    # 1x1 conv weights stored as (in_C, out_C) matmul matrices.
    wqkv = jax.random.normal(k2, (C, 3 * C), jnp.float32) / math.sqrt(C)
    bqkv = 0.1 * jax.random.normal(k3, (3 * C,), jnp.float32)
    wproj = jax.random.normal(k4, (C, C), jnp.float32) / math.sqrt(C)
    bproj = 0.1 * jax.random.normal(k5, (C,), jnp.float32)
    return gamma, beta, wqkv, bqkv, wproj, bproj


if __name__ == "__main__":
    # C must be a multiple of head_dim=64 and num_groups=32; use C=128 (2 heads,
    # lane-dense channels), spatial 16x16 -> S=256, batch 2.  Tile size 128
    # exercises the multi-tile sequence / q paths (2 tiles each).
    B, C, H, W = 2, 128, 16, 16
    key = jax.random.PRNGKey(0)
    kx, kp = jax.random.split(key)
    x = jax.random.normal(kx, (B, C, H, W), jnp.float32)
    params = make_params(kp, C)

    out = attn_block(x, params, block_s=128, block_q=128)
    out = jax.block_until_ready(out)

    ref = jax.block_until_ready(attn_block_reference(x, params))
    # bf16 matmul operands (f32 accumulation) -> loosen tolerance vs. f32 reference.
    np.testing.assert_allclose(np.asarray(out), np.asarray(ref), rtol=5e-2, atol=5e-2)

    print("KERNEL_OK")
</pallas_src>

<mosaic_0001>
module attributes {stable_mosaic.version = 11 : i64} {
  func.func @_gn_stats_kernel(%arg0: i32, %arg1: i32, %arg2: memref<1x128x128xf32, #tpu.memory_space<vmem>>, %arg3: memref<128x128xf32, #tpu.memory_space<vmem>>, %arg4: memref<1x2x128xf32, #tpu.memory_space<vmem>>, %arg5: memref<8x128xf32, #tpu.memory_space<vmem>>, %arg6: memref<8x128xf32, #tpu.memory_space<vmem>>) attributes {dimension_semantics = [#tpu.dimension_semantics<parallel>, #tpu.dimension_semantics<arbitrary>], iteration_bounds = array<i64: 2, 2>, scalar_prefetch = 0 : i64, scratch_operands = 2 : i64, tpu.core_type = #tpu.core_type<tc>, window_params = [{transform_indices = @transform_0, window_bounds = array<i64: 1, 128, 128>}, {pipeline_mode = #tpu.pipeline_mode<synchronous>, transform_indices = @transform_1, window_bounds = array<i64: 128, 128>}, {transform_indices = @transform_2, window_bounds = array<i64: 1, 2, 128>}]} {
    %c0_i32 = arith.constant 0 : i32
    %0 = arith.cmpi eq, %arg1, %c0_i32 : i32
    %1 = arith.extui %0 : i1 to i32
    %c0_i32_0 = arith.constant 0 : i32
    %2 = arith.cmpi ne, %1, %c0_i32_0 : i32
    scf.if %2 {
      %cst_13 = arith.constant 0.000000e+00 : f32
      %18 = vector.broadcast %cst_13 : f32 to vector<8x128xf32>
      %c0_14 = arith.constant 0 : index
      %c0_15 = arith.constant 0 : index
      %19 = vector.load %arg5[%c0_14, %c0_15] : memref<8x128xf32, #tpu.memory_space<vmem>>, vector<8x128xf32>
      tpu.vector_store %arg5[%c0_14, %c0_15], %18 {strides = array<i32>} : memref<8x128xf32, #tpu.memory_space<vmem>>, vector<8x128xf32>,
      %cst_16 = arith.constant 0.000000e+00 : f32
      %20 = vector.broadcast %cst_16 : f32 to vector<8x128xf32>
      %c0_17 = arith.constant 0 : index
      %c0_18 = arith.constant 0 : index
      %21 = vector.load %arg6[%c0_17, %c0_18] : memref<8x128xf32, #tpu.memory_space<vmem>>, vector<8x128xf32>
      tpu.vector_store %arg6[%c0_17, %c0_18], %20 {strides = array<i32>} : memref<8x128xf32, #tpu.memory_space<vmem>>, vector<8x128xf32>,
    } else {
    }
    %c0 = arith.constant 0 : index
    %c0_1 = arith.constant 0 : index
    %c0_2 = arith.constant 0 : index
    %3 = vector.load %arg2[%c0, %c0_1, %c0_2] : memref<1x128x128xf32, #tpu.memory_space<vmem>>, vector<1x128x128xf32>
    %4 = vector.shape_cast %3 : vector<1x128x128xf32> to vector<128x128xf32>
    %5 = vector.shape_cast %4 : vector<128x128xf32> to vector<16x8x128xf32>
    %c0_3 = arith.constant 0 : index
    %c0_4 = arith.constant 0 : index
    %6 = vector.load %arg5[%c0_3, %c0_4] : memref<8x128xf32, #tpu.memory_space<vmem>>, vector<8x128xf32>
    %cst = arith.constant dense<0.000000e+00> : vector<8x128xf32>
    %7 = vector.multi_reduction <add>, %5, %cst [0] : vector<16x8x128xf32> to vector<8x128xf32>
    %8 = arith.addf %6, %7 : vector<8x128xf32>
    %c0_5 = arith.constant 0 : index
    %c0_6 = arith.constant 0 : index
    %9 = vector.load %arg5[%c0_5, %c0_6] : memref<8x128xf32, #tpu.memory_space<vmem>>, vector<8x128xf32>
    tpu.vector_store %arg5[%c0_5, %c0_6], %8 {strides = array<i32>} : memref<8x128xf32, #tpu.memory_space<vmem>>, vector<8x128xf32>,
    %c0_7 = arith.constant 0 : index
    %c0_8 = arith.constant 0 : index
    %10 = vector.load %arg6[%c0_7, %c0_8] : memref<8x128xf32, #tpu.memory_space<vmem>>, vector<8x128xf32>
    %11 = arith.mulf %5, %5 : vector<16x8x128xf32>
    %cst_9 = arith.constant dense<0.000000e+00> : vector<8x128xf32>
    %12 = vector.multi_reduction <add>, %11, %cst_9 [0] : vector<16x8x128xf32> to vector<8x128xf32>
    %13 = arith.addf %10, %12 : vector<8x128xf32>
    %c0_10 = arith.constant 0 : index
    %c0_11 = arith.constant 0 : index
    %14 = vector.load %arg6[%c0_10, %c0_11] : memref<8x128xf32, #tpu.memory_space<vmem>>, vector<8x128xf32>
    tpu.vector_store %arg6[%c0_10, %c0_11], %13 {strides = array<i32>} : memref<8x128xf32, #tpu.memory_space<vmem>>, vector<8x128xf32>,
    %c1_i32 = arith.constant 1 : i32
    %15 = arith.cmpi eq, %arg1, %c1_i32 : i32
    %16 = arith.extui %15 : i1 to i32
    %c0_i32_12 = arith.constant 0 : i32
    %17 = arith.cmpi ne, %16, %c0_i32_12 : i32
    scf.if %17 {
      %c0_13 = arith.constant 0 : index
      %c0_14 = arith.constant 0 : index
      %18 = vector.load %arg5[%c0_13, %c0_14] : memref<8x128xf32, #tpu.memory_space<vmem>>, vector<8x128xf32>
      %cst_15 = arith.constant dense<0.000000e+00> : vector<128xf32>
      %19 = vector.multi_reduction <add>, %18, %cst_15 [0] : vector<8x128xf32> to vector<128xf32>
      %20 = vector.shape_cast %19 : vector<128xf32> to vector<1x128xf32>
      %c0_16 = arith.constant 0 : index
      %c0_17 = arith.constant 0 : index
      %21 = vector.load %arg6[%c0_16, %c0_17] : memref<8x128xf32, #tpu.memory_space<vmem>>, vector<8x128xf32>
      %cst_18 = arith.constant dense<0.000000e+00> : vector<128xf32>
      %22 = vector.multi_reduction <add>, %21, %cst_18 [0] : vector<8x128xf32> to vector<128xf32>
      %23 = vector.shape_cast %22 : vector<128xf32> to vector<1x128xf32>
      %24 = tpu.concatenate %20, %23 in 0 : vector<1x128xf32>, vector<1x128xf32> -> vector<2x128xf32>
      %c0_19 = arith.constant 0 : index
      %c0_20 = arith.constant 0 : index
      %25 = vector.load %arg3[%c0_19, %c0_20] : memref<128x128xf32, #tpu.memory_space<vmem>>, vector<128x128xf32>
      %cst_21 = arith.constant dense<0.000000e+00> : vector<2x128xf32>
      %26 = tpu.matmul %24, %25, %cst_21 {dimension_numbers = #tpu.dot_dimension_numbers<[1], [0], [0], [1], [0, 0, 1, 1], [], []>} : vector<2x128xf32>, vector<128x128xf32>, vector<2x128xf32> -> vector<2x128xf32>
      %cst_22 = arith.constant 3.906250e-03 : f32
      %27 = vector.broadcast %cst_22 : f32 to vector<2x128xf32>
      %28 = arith.mulf %26, %27 : vector<2x128xf32>
      %29 = vector.extract_strided_slice %28 {offsets = [0, 0], sizes = [1, 128], strides = [1, 1]} : vector<2x128xf32> to vector<1x128xf32>
      %30 = vector.extract_strided_slice %28 {offsets = [1, 0], sizes = [1, 128], strides = [1, 1]} : vector<2x128xf32> to vector<1x128xf32>
      %31 = arith.mulf %29, %29 : vector<1x128xf32>
      %32 = arith.subf %30, %31 : vector<1x128xf32>
      %cst_23 = arith.constant 9.99999997E-7 : f32
      %33 = vector.broadcast %cst_23 : f32 to vector<1x128xf32>
      %34 = arith.addf %32, %33 : vector<1x128xf32>
      %35 = math.rsqrt %34 : vector<1x128xf32>
      %36 = tpu.concatenate %29, %35 in 0 : vector<1x128xf32>, vector<1x128xf32> -> vector<2x128xf32>
      %c0_24 = arith.constant 0 : index
      %c0_25 = arith.constant 0 : index
      %c0_26 = arith.constant 0 : index
      %37 = vector.load %arg4[%c0_24, %c0_25, %c0_26] : memref<1x2x128xf32, #tpu.memory_space<vmem>>, vector<1x2x128xf32>
      %38 = vector.shape_cast %37 : vector<1x2x128xf32> to vector<2x128xf32>
      %39 = vector.shape_cast %36 : vector<2x128xf32> to vector<1x2x128xf32>
      tpu.vector_store %arg4[%c0_24, %c0_25, %c0_26], %39 {strides = array<i32>} : memref<1x2x128xf32, #tpu.memory_space<vmem>>, vector<1x2x128xf32>,
    } else {
    }
    return
  }
  func.func @transform_0(%arg0: i32, %arg1: i32) -> (i32, i32, i32) {
    %c0_i32 = arith.constant 0 : i32
    %c0_i32_0 = arith.constant 0 : i32
    return %arg0, %arg1, %c0_i32 : i32, i32, i32
  }
  func.func @transform_1(%arg0: i32, %arg1: i32) -> (i32, i32) {
    %c0_i32 = arith.constant 0 : i32
    %c0_i32_0 = arith.constant 0 : i32
    %c0_i32_1 = arith.constant 0 : i32
    return %c0_i32, %c0_i32_0 : i32, i32
  }
  func.func @transform_2(%arg0: i32, %arg1: i32) -> (i32, i32, i32) {
    %c0_i32 = arith.constant 0 : i32
    %c0_i32_0 = arith.constant 0 : i32
    %c0_i32_1 = arith.constant 0 : i32
    return %arg0, %c0_i32, %c0_i32_0 : i32, i32, i32
  }
}

</mosaic_0001>

<bundles_post_ra>
// kernel: tpu_custom_call.1
= control target key start
LH: loop header
LB: loop body
LE: loop exit
PB: predicated region body
PF: predicated region fallthrough
CT: control target
= control target key end

     0   :  { %s1031_s0 = inlined_call_operand.hbm [shape: f32[2,256,128], index: 0, kind: input, shape index: {}]   ;;  %s1032_s1 = inlined_call_operand.hbm [shape: f32[128,128], index: 1, kind: input, shape index: {}]   ;;  %s1033_s2 = inlined_call_operand.hbm [shape: f32[2,2,128], index: 2, kind: output, shape index: {}]  }
   0x1   :  { %1043 = sst [smem:[#allocation19_spill]] %s1032_s1 }
   0x2   :  { %1044 = sst [smem:[#allocation20_spill]] %s1033_s2 }
   0x3   :  { %7 = vsyncpa [#allocation5], 0 }
   0x4   :  { %9 = vsyncpa [#allocation5 + $0x1], 0 }
   0x5   :  { %10 = vsyncpa [#allocation8], 0 }
   0x6   :  { %11 = vsyncpa [#allocation6], 0 }
   0x7   :  { %13 = vsyncpa [#allocation6 + $0x1], 0  ;;  %s801_s9 = smov 0   ;;  %s803_s10 = smov 0  }
   0x8   :  { %s805_s11 = smov 0   ;;  %s807_s12 = smov 0  }
   0x9   :  { %s809_s13 = smov 0   ;;  %s811_s14 = smov 0  }
   0xa   :  { %s813_s15 = smov 0   ;;  %s815_s16 = smov 0  }
   0xb   :  { %s817_s17 = smov 0   ;;  %s819_s18 = smov 0  }
   0xc   :  { %s821_s19 = smov 0  }
   0xd LB: > { %1045 = sst [smem:[#allocation13_spill]] %s740_s9  ;;  %s457_s20 = sadd.s32 4294967295, %s780_s19   ;;  %s780_s19 = sphi %s821_s19, %s19_s19   ;;  %s776_s18 = sphi %s819_s18, %s1076_s18   ;;  %s772_s17 = sphi %s817_s17, %s1075_s17   ;;  %s768_s16 = sphi %s815_s16, %s1074_s16   ;;  %s764_s15 = sphi %s813_s15, %s1073_s15   ;;  %s760_s14 = sphi %s811_s14, %s1072_s14   ;;  %s756_s13 = sphi %s809_s13, %s1071_s13   ;;  %s752_s12 = sphi %s807_s12, %s1070_s12   ;;  %s748_s11 = sphi %s805_s11, %s1069_s11   ;;  %s744_s10 = sphi %s803_s10, %s1068_s10   ;;  %s740_s9 = sphi %s801_s9, %s1067_s9  }
   0xe   : > { %1046 = sst [smem:[#allocation14_spill]] %s768_s16  ;;  %s458_s21 = sadd.s32 4294967294, %s780_s19  }
   0xf   : > { %p53_p0 = scmp.ne.s32.totalorder %s756_s13, %s752_s12  ;;  %p857_p1 = scmp.eq.s32.totalorder %s457_s20, 0 }
  0x10   : > { %p97_p2 = scmp.ne.s32.totalorder %s748_s11, %s744_s10  ;;  %p98_p3 = scmp.eq.s32.totalorder %s457_s20, 3 }
  0x11   : > { %p865_p4 = por %p857_p1, %p53_p0  ;;  %p103_p5 = scmp.ne.s32.totalorder %s744_s10, %s740_s9 }
  0x12   : > { %p871_p6 = por %p98_p3, %p97_p2  ;;  %p104_p7 = scmp.eq.s32.totalorder %s458_s21, 3 }
  0x13   : > { %p459_p8 = scmp.ge.s32.totalorder %s780_s19, 1  ;;  %p111_p9 = scmp.lt.s32.totalorder %s780_s19, 5 }
  0x14   : > { %s1049_s24 = scalar_select %p871_p6, 1, 0 }
  0x15   : > { %p877_p10 = por %p104_p7, %p103_p5  ;;  %p881_p11 = pnand %p459_p8, %p111_p9 }
  0x16   : > { %1050 = sst [smem:[#allocation15_spill]] %s1049_s24  ;;  %s782_s30 = smov [#allocation7]  }
  0x17   : > { %s1051_s25 = scalar_select %p877_p10, 1, 0 }
  0x18   : > { %s1054_s1 = sld [smem:[#allocation19_spill]]  ;;  %p484_p12 = pneg %p881_p11 }
  0x19   : > { %1052 = sst [smem:[#allocation16_spill]] %s1051_s25  ;;  %s124_s3 = sshll.u32 %s782_s30, 4  ;;  %s125_s3 = int_to_ptr.vmem [resolvable:$true] %s124_s3 }
  0x1a   : > { %p485_p13 = pnand %p484_p12, %p857_p1  ;;  %s1034_s4 = smov 128  }
  0x1b   : > { %s1035_s5 = smov 8   ;;  %s28_s6 = sadd.s32 1, %s772_s17 }
  0x1c   : > { %p29_p0 = scmp.ge.s32.totalorder %s28_s6, 2  ;;  %s31_s7 = sadd.s32 1, %s776_s18 }
  0x1d   : > { %p47_p2 = scmp.ne.s32.totalorder %s760_s14, %s756_s13  ;;  %p48_p3 = scmp.eq.s32.totalorder %s780_s19, 0 }
  0x1e   : > { %s122_s29 = sshll.u32 %s1054_s1, 4  ;;  %s1078_s6 = smov (%p29_p0, %s28_s6), 0  ;;  %s123_s29 = int_to_ptr.hbm [resolvable:$true] %s122_s29 }
  0x1f   : > { %487 = dma.hbm_to_vmem [thread:$0]  (!%p485_p13), %s123_s29, 2048, %s125_s3, [#allocation8], %s1034_s4, %s1034_s4, %s1035_s5  }
  0x20   : > { %1055 = sst [smem:[#allocation17_spill]] %s1078_s6  ;;  %s1080_s7 = smov (!%p29_p0, %s31_s7), %s776_s18 }
  0x21   : > { %s36_s8 = ssub.s32 %s772_s17, %s1078_s6  ;;  %s40_s12 = sadd.s32 1, %s760_s14 }
  0x22   : > { %p33_p5 = scmp.ge.s32.totalorder %s1080_s7, 2  ;;  %p906_p7 = por %p48_p3, %p47_p2 }
  0x23   : > { %s87_s21 = sadd.s32 1, %s748_s11  ;;  %s138_s27 = sand.u32 1, %s760_s14  }
  0x24   : > { %s1082_s7 = smov (%p33_p5, %s1080_s7), 0  ;;  %p497_p8 = scmp.lt.s32.totalorder %s780_s19, 4 }
  0x25   : > { %1057 = sst [smem:[#allocation18_spill]] %s1082_s7  ;;  %s462_s28 = sshll.u32 %s138_s27, 7 }
  0x26   : > { %s35_s29 = ssub.s32 %s776_s18, %s1082_s7  ;;  %s463_s3 = sshll.u32 %s772_s17, 4 }
  0x27   : > { %s37_s30 = sor.u32 %s36_s8, %s35_s29  ;;  %p85_p9 = scmp.eq.s32.totalorder %s35_s29, 0 }
  0x28   : > { %p38_p12 = scmp.eq.s32.totalorder %s37_s30, 0  ;;  %s464_s1 = sshll.u32 %s776_s18, 5 }
  0x29   : > { %s919_s4 = scalar_select %p85_p9, %s748_s11, %s87_s21  }
  0x2a   : > { %s922_s5 = scalar_select %p38_p12, %s760_s14, %s40_s12  }
  0x2b   : > { %s142_s6 = scalar_lea.vmem [#allocation4], %s462_s28  ;;  %s147_s9 = sadd.s32 %s464_s1, %s463_s3 }
  0x2c   : > { %s152_s25 = sshll.u32 %s142_s6, 4  ;;  %s465_s2 = sshll.u32 %s147_s9, 3  ;;  %s153_s25 = int_to_ptr.vmem [resolvable:$true] %s152_s25 }
  0x2d   : > { %p489_p13 = pnand %p497_p8, %p906_p7  ;;  %s149_s7 = scalar_lea.hbm %s1031_s0, %s465_s2 }
  0x2e   : > { %s150_s8 = sshll.u32 %s149_s7, 4  ;;  %s139_s29 = scalar_lea.sflag [#allocation5], %s138_s27  ;;  %s151_s8 = int_to_ptr.hbm [resolvable:$true] %s150_s8 }
  0x2f   : > { %s1058_s21 = smov 8   ;;  %s1059_s30 = smov 128  }
  0x30   : > { %491 = dma.hbm_to_vmem [thread:$0]  (!%p489_p13), %s151_s8, 2048, %s153_s25, %s139_s29, %s1059_s30, %s1059_s30, %s1058_s21  }
  0x31   : > { %164 = sbr.rel (%p881_p11) target bundleno = 312 (0x138), region = 28  ;;  %s166_s1 = sand.u32 (!%p881_p11), 1, %s756_s13  }
  0x32   : > { %s467_s9 = sshll.u32 (!%p881_p11), %s166_s1, 7  ;;  %s167_s6 = scalar_lea.sflag (!%p881_p11), [#allocation5], %s166_s1 }
  0x33   : > { %s938_s12 = scalar_lea.vmem (!%p881_p11), [#allocation4], %s467_s9 }
  0x36   : > { %727 = dma.done.wait (%p865_p4), %s167_s6, 2048  }
  0x37   : > { %729 = vsyncadd (%p865_p4), %s167_s6, 4294965248 }
  0x38   : > { %731 = dma.done.wait (%p857_p1), [#allocation8], 2048  }
  0x39   : > { %733 = vsyncadd (%p857_p1), [#allocation8], 4294965248  ;;  %s194_s2 = sand.u32 1, %s744_s10   ;;  %p470_p11 = scmp.ne.s32.totalorder %s764_s15, 0 }
  0x3a   : > { %s951_s16 = sshll.u32 %s194_s2, 1 }
  0x3b   : > { %s196_s24 = scalar_lea.vmem [#allocation9], %s951_s16  ;;  %201 = sbr.rel (%p470_p11) target bundleno = 67 (0x43), region = 40 }
  0x40   : > { %v785_v0 = vmov 0.0  }
  0x41   : > { %202 = vst [vmem:[#allocation2] sm:$0xff] %v785_v0 }
  0x42   : > { %203 = vst [vmem:[#allocation3] sm:$0xff] %v785_v0 }
  0x43 PF: > { %v204_v1 = vld [vmem:[%s938_s12] sm:$0xff]  ;;  %v205_v2 = vld [vmem:[%s938_s12 + $0x8] sm:$0xff]  ;;  %v206_v3 = vld [vmem:[%s938_s12 + $0x10] sm:$0xff]  ;;  %p471_p1 = scmp.ne.s32.totalorder %s764_s15, 1 }
  0x44   : > { %v207_v4 = vld [vmem:[%s938_s12 + $0x18] sm:$0xff]  ;;  %v221_v5 = vadd.f32 %v205_v2, %v204_v1  ;;  %v239_v6 = vmul.f32 %v204_v1, %v204_v1  ;;  %v240_v7 = vmul.f32 %v205_v2, %v205_v2  ;;  %v241_v8 = vmul.f32 %v206_v3, %v206_v3  ;;  %v208_v9 = vld [vmem:[%s938_s12 + $0x20] sm:$0xff]  ;;  %v209_v13 = vld [vmem:[%s938_s12 + $0x28] sm:$0xff] }
  0x45   : > { %v242_v11 = vmul.f32 %v207_v4, %v207_v4  ;;  %v243_v15 = vmul.f32 %v208_v9, %v208_v9  ;;  %v210_v17 = vld [vmem:[%s938_s12 + $0x30] sm:$0xff]  ;;  %v244_v19 = vmul.f32 %v209_v13, %v209_v13  ;;  %v211_v21 = vld [vmem:[%s938_s12 + $0x38] sm:$0xff]  ;;  %v212_v25 = vld [vmem:[%s938_s12 + $0x40] sm:$0xff] }
  0x46   : > { %v222_v10 = vadd.f32 %v221_v5, %v206_v3  ;;  %v255_v12 = vadd.f32 %v240_v7, %v239_v6  ;;  %v245_v23 = vmul.f32 %v210_v17, %v210_v17  ;;  %v246_v27 = vmul.f32 %v211_v21, %v211_v21  ;;  %v213_v29 = vld [vmem:[%s938_s12 + $0x48] sm:$0xff]  ;;  %v214_v33 = vld [vmem:[%s938_s12 + $0x50] sm:$0xff]  ;;  %v215_v37 = vld [vmem:[%s938_s12 + $0x58] sm:$0xff] }
  0x47   : > { %v247_v31 = vmul.f32 %v212_v25, %v212_v25  ;;  %v248_v35 = vmul.f32 %v213_v29, %v213_v29  ;;  %v249_v39 = vmul.f32 %v214_v33, %v214_v33  ;;  %v216_v41 = vld [vmem:[%s938_s12 + $0x60] sm:$0xff]  ;;  %v250_v43 = vmul.f32 %v215_v37, %v215_v37  ;;  %v217_v45 = vld [vmem:[%s938_s12 + $0x68] sm:$0xff]  ;;  %v218_v49 = vld [vmem:[%s938_s12 + $0x70] sm:$0xff] }
  0x48   : > { %v223_v14 = vadd.f32 %v222_v10, %v207_v4  ;;  %v256_v16 = vadd.f32 %v255_v12, %v241_v8  ;;  %v251_v47 = vmul.f32 %v216_v41, %v216_v41  ;;  %v252_v51 = vmul.f32 %v217_v45, %v217_v45  ;;  %v219_v53 = vld [vmem:[%s938_s12 + $0x78] sm:$0xff]  ;;  %v220_v58 = vld [vmem:[#allocation2] sm:$0xff] }
  0x49   : > { %v253_v55 = vmul.f32 %v218_v49, %v218_v49  ;;  %v254_v59 = vmul.f32 %v219_v53, %v219_v53  ;;  %v238_v0 = vld [vmem:[#allocation3] sm:$0xff] }
  0x4a   : > { %v224_v18 = vadd.f32 %v223_v14, %v208_v9  ;;  %v257_v20 = vadd.f32 %v256_v16, %v242_v11 }
  0x4c   : > { %v225_v22 = vadd.f32 %v224_v18, %v209_v13  ;;  %v258_v24 = vadd.f32 %v257_v20, %v243_v15 }
  0x4e   : > { %v226_v26 = vadd.f32 %v225_v22, %v210_v17  ;;  %v259_v28 = vadd.f32 %v258_v24, %v244_v19 }
  0x50   : > { %v227_v30 = vadd.f32 %v226_v26, %v211_v21  ;;  %v260_v32 = vadd.f32 %v259_v28, %v245_v23 }
  0x52   : > { %v228_v34 = vadd.f32 %v227_v30, %v212_v25  ;;  %v261_v36 = vadd.f32 %v260_v32, %v246_v27 }
  0x54   : > { %v229_v38 = vadd.f32 %v228_v34, %v213_v29  ;;  %v262_v40 = vadd.f32 %v261_v36, %v247_v31 }
  0x56   : > { %v230_v42 = vadd.f32 %v229_v38, %v214_v33  ;;  %v263_v44 = vadd.f32 %v262_v40, %v248_v35 }
  0x58   : > { %v231_v46 = vadd.f32 %v230_v42, %v215_v37  ;;  %v264_v48 = vadd.f32 %v263_v44, %v249_v39 }
  0x5a   : > { %v232_v50 = vadd.f32 %v231_v46, %v216_v41  ;;  %v265_v52 = vadd.f32 %v264_v48, %v250_v43 }
  0x5c   : > { %v233_v54 = vadd.f32 %v232_v50, %v217_v45  ;;  %v266_v56 = vadd.f32 %v265_v52, %v251_v47 }
  0x5e   : > { %v234_v57 = vadd.f32 %v233_v54, %v218_v49  ;;  %v267_v60 = vadd.f32 %v266_v56, %v252_v51 }
  0x60   : > { %v235_v61 = vadd.f32 %v234_v57, %v219_v53  ;;  %v268_v62 = vadd.f32 %v267_v60, %v253_v55 }
  0x62   : > { %v236_v63 = vadd.f32 %v235_v61, %v220_v58  ;;  %v269_v1 = vadd.f32 %v268_v62, %v254_v59  ;;  %275 = sbr.rel (%p471_p1) target bundleno = 291 (0x123), region = 44 }
  0x64   : > { %237 = vst [vmem:[#allocation2] sm:$0xff] %v236_v63  ;;  %v270_v2 = vadd.f32 %v269_v1, %v238_v0 }
  0x66   : > { %271 = vst [vmem:[#allocation3] sm:$0xff] %v270_v2 }
  0x67   : > { %v307_v3 = vld [vmem:[#allocation7 + $0x78] sm:$0xff]  ;;  %v306_v4 = vld [vmem:[#allocation7 + $0x70] sm:$0xff]  ;;  %v305_v5 = vld [vmem:[#allocation7 + $0x68] sm:$0xff]  ;;  %vm290_vm0 = vcmask 1040384  }
  0x68   : > { %308 = vmatpush.msra.mxu0 %v307_v3  ;;  %v304_v6 = vld [vmem:[#allocation7 + $0x60] sm:$0xff]  ;;  %v303_v9 = vld [vmem:[#allocation7 + $0x58] sm:$0xff]  ;;  %v302_v12 = vld [vmem:[#allocation7 + $0x50] sm:$0xff] }
  0x69   : > { %v301_v15 = vld [vmem:[#allocation7 + $0x48] sm:$0xff]  ;;  %v300_v16 = vld [vmem:[#allocation7 + $0x40] sm:$0xff]  ;;  %v299_v19 = vld [vmem:[#allocation7 + $0x38] sm:$0xff] }
  0x6a   : > { %309 = vmatpush.msra.mxu0 %v306_v4  ;;  %v298_v20 = vld [vmem:[#allocation7 + $0x30] sm:$0xff]  ;;  %v297_v23 = vld [vmem:[#allocation7 + $0x28] sm:$0xff]  ;;  %v296_v24 = vld [vmem:[#allocation7 + $0x20] sm:$0xff] }
  0x6b   : > { %v276_v7 = vld [vmem:[#allocation2] sm:$0xff]  ;;  %v295_v27 = vld [vmem:[#allocation7 + $0x18] sm:$0xff]  ;;  %v293_v31 = vld [vmem:[#allocation7 + $0x8] sm:$0xff] }
  0x6c   : > { %310 = vmatpush.msra.mxu0 %v305_v5  ;;  %v277_v10 = vrot.slane %v276_v7, 4  ;;  %v294_v28 = vld [vmem:[#allocation7 + $0x10] sm:$0xff]  ;;  %v292_v32 = vld [vmem:[#allocation7] sm:$0xff] }
  0x6d   : > { %v283_v8 = vld [vmem:[#allocation3] sm:$0xff] }
  0x6e   : > { %v284_v11 = vrot.slane %v283_v8, 4  ;;  %311 = vmatpush.msra.mxu0 %v304_v6  ;;  %v278_v13 = vadd.f32 %v277_v10, %v276_v7 }
  0x70   : > { %312 = vmatpush.msra.mxu0 %v303_v9  ;;  %v285_v14 = vadd.f32 %v284_v11, %v283_v8  ;;  %v279_v17 = vrot.slane %v278_v13, 2 }
  0x72   : > { %313 = vmatpush.msra.mxu0 %v302_v12  ;;  %v286_v18 = vrot.slane %v285_v14, 2  ;;  %v280_v21 = vadd.f32 %v279_v17, %v278_v13 }
  0x74   : > { %314 = vmatpush.msra.mxu0 %v301_v15  ;;  %v287_v22 = vadd.f32 %v286_v18, %v285_v14  ;;  %v281_v25 = vrot.slane %v280_v21, 1 }
  0x76   : > { %315 = vmatpush.msra.mxu0 %v300_v16  ;;  %v288_v26 = vrot.slane %v287_v22, 1  ;;  %v282_v29 = vadd.f32 %v281_v25, %v280_v21 }
  0x78   : > { %316 = vmatpush.msra.mxu0 %v299_v19  ;;  %v289_v30 = vadd.f32 %v288_v26, %v287_v22 }
  0x7a   : > { %317 = vmatpush.msra.mxu0 %v298_v20  ;;  %v291_v33 = vsel %vm290_vm0, %v282_v29, %v289_v30 }
  0x7c   : > { %318 = vmatpush.msra.mxu0 %v297_v23 }
  0x7e   : > { %319 = vmatpush.msra.mxu0 %v296_v24 }
  0x80   : > { %320 = vmatpush.msra.mxu0 %v295_v27 }
  0x82   : > { %321 = vmatpush.msra.mxu0 %v294_v28 }
  0x84   : > { %322 = vmatpush.msra.mxu0 %v293_v31 }
  0x86   : > { %323 = vmatpush.msra.mxu0 %v292_v32 }
  0x87   : > { %324 = vmatmul.f32.vlgmr.msra.gmra.mxu0 %v291_v33 }
 0x104   : > { %v325_v34 = vpop.f32.mrf.mxu0 }
 0x105   : > { %v328_v35 = vmul.f32 0.00390625, %v325_v34 }
 0x107   : > { %v329_v36 = vmul.f32 %v328_v35, %v328_v35 }
 0x109   : > { %v331_v37 = vrot.slane %v329_v36, 7 }
 0x10b   : > { %v333_v38 = vsub.f32 %v328_v35, %v331_v37 }
 0x10d   : > { %v334_v39 = vadd.f32 1e-06, %v333_v38 }
 0x10f   : > { %592 = vrsqrt.f32 %v334_v39  ;;  %vm341_vm2 = vweird.f32 %v334_v39 }
 0x115   : > { %v593_v40 = vpop.eup %592 }
 0x116   : > { %v336_v41 = vmul.f32 %v593_v40, %v334_v39  ;;  %vm342_vm1 = vweird.f32 %v593_v40 }
 0x117   : > { %vm343_vm3 = vmor %vm341_vm2, %vm342_vm1 }
 0x118   : > { %v337_v42 = vmul.f32 %v593_v40, %v336_v41 }
 0x11a   : > { %v338_v43 = vmul.f32 0.5, %v337_v42 }
 0x11c   : > { %v339_v44 = vsub.f32 1.5, %v338_v43 }
 0x11e   : > { %v340_v45 = vmul.f32 %v593_v40, %v339_v44 }
 0x120   : > { %v344_v46 = vsel %vm343_vm3, %v593_v40, %v340_v45 }
 0x121   : > { %v345_v47 = vsel %vm290_vm0, %v328_v35, %v344_v46 }
 0x122   : > { %346 = vst [vmem:[%s196_s24] sm:$0x3] %v345_v47 }
 0x123 PF: > { %s1060_s15 = sld [smem:[#allocation14_spill]]  ;;  %s360_s27 = sshll.u32 %s196_s24, 4  ;;  %s361_s27 = int_to_ptr.vmem [resolvable:$true] %s360_s27 }
 0x124   : > { %s1062_s7 = sld [smem:[#allocation20_spill]]  ;;  %s348_s3 = scalar_lea.sflag [#allocation6], %s194_s2 }
 0x129   : > { %s473_s23 = sshll.u32 %s1060_s15, 1 }
 0x12a   : > { %s358_s20 = scalar_lea.hbm %s1062_s7, %s473_s23  ;;  %s674_s1 = scalar_lea.hbm %s1062_s7, 4 }
 0x12b   : > { %s362_s28 = sshll.u32 %s358_s20, 4  ;;  %s363_s28 = int_to_ptr.hbm [resolvable:$true] %s362_s28 }
 0x12c   : > { %s668_s8 = sshra.s32 %s363_s28, 4  ;;  %s669_s8 = int_to_ptr.hbm [resolvable:$true] %s668_s8 }
 0x12d   : > { %s670_s29 = scalar_lea.hbm %s669_s8, 2  ;;  %p675_p3 = scmp.lt.s32.totalorder %s669_s8, %s1062_s7 }
 0x12e   : > { %p671_p4 = scmp.ne.s32.totalorder %s669_s8, %s670_s29  ;;  %p676_p5 = scmp.lt.s32.totalorder %s674_s1, %s670_s29 }
 0x130   : > { %p672_p0 = pnand %p671_p4, %p871_p6  ;;  %p677_p7 = por %p676_p5, %p675_p3 }
 0x132   : > { %p673_p2 = pneg %p672_p0 }
 0x134   : > { %p678_p8 = pnand %p677_p7, %p673_p2 }
 0x136   : > { %681 = shalt.err (!%p678_p8)
}
 0x137   : > { %482 = dma.vmem_to_hbm [thread:$0]  (%p871_p6), %s361_s27, 32, %s363_s28, %s348_s3  }
 0x138 PF: > { %s1063_s12 = sld [smem:[#allocation13_spill]]  ;;  %p499_p9 = scmp.ge.s32.totalorder %s780_s19, 2 }
 0x13a   : > { %p493_p12 = pnand %p499_p9, %p877_p10 }
 0x13c   : > { %p494_p13 = pneg %p493_p12 }
 0x13e   : > { %s374_s16 = sand.u32 1, %s1063_s12  }
 0x13f   : > { %s375_s24 = scalar_lea.sflag [#allocation6], %s374_s16 }
 0x140   : > { %735 = dma.done.wait (%p494_p13), %s375_s24, 32  }
 0x141   : > { %737 = vsyncadd (%p494_p13), %s375_s24, 4294967264  ;;  %s19_s19 = sadd.s32 1, %s780_s19   ;;  %s1065_s22 = sld [smem:[#allocation17_spill]] }
 0x142   : > { %p16_p11 = scmp.ge.s32.totalorder %s19_s19, 6   ;;  %s1066_s23 = sld [smem:[#allocation18_spill]] }
 0x143   : > { %s1067_s9 = smov %s744_s10  ;;  %s1068_s10 = smov %s748_s11 }
 0x144   : > { %s1069_s11 = smov %s919_s4  ;;  %s1070_s12 = smov %s756_s13 }
 0x145   : > { %s1071_s13 = smov %s760_s14  ;;  %s1072_s14 = smov %s922_s5 }
 0x146   : > { %s1073_s15 = smov %s772_s17  ;;  %s1074_s16 = smov %s776_s18 }
 0x147   : > { %s1075_s17 = smov %s1065_s22  ;;  %18 = sbr.rel (!%p16_p11) target bundleno = 13 (0xd), region = 85 }
 0x148   : > { %s1076_s18 = smov %s1066_s23 }
 0x14c   :  { %381 = vsyncpa [#allocation5], 1 }
 0x14d   :  { %383 = vsyncpa [#allocation5 + $0x1], 1 }
 0x14e   :  { %384 = vsyncpa [#allocation8], 1 }
 0x14f   :  { %385 = vsyncpa [#allocation6], 1 }
 0x150   :  { %387 = vsyncpa [#allocation6 + $0x1], 1 }

</bundles_post_ra>
